<compile_context>
chip_gen: v6e
topology: v6e:2x2x1
jax: 0.10.0
libtpu: 0.0.40
codegen_flags: <defaults>
</compile_context>

<pallas_src>
import jax
import jax.numpy as jnp
from jax.experimental import pallas as pl
from jax.experimental.pallas import tpu as pltpu


def _round_up(x: int, m: int) -> int:
    return (x + m - 1) // m * m


def _hybrid_kernel(
    ids_ref,      # (TB, 2) int32   [:,0]=user id, [:,1]=item id
    feat_ref,     # (TB, F) bf16
    ufused_ref,   # (Up, E) bf16    user_embeddings @ w3_user (precomputed)
    ifused_ref,   # (Ip, E) bf16    item_embeddings @ w3_item (precomputed)
    w1_ref,       # (F, E)  bf16    content_transform.0 weight
    wstk_ref,     # (2, E, E) bf16  [w2 (content_transform.3), w3_content]
    w4t_ref,      # (1, E)  bf16    predictor.3 weight, transposed
    b_ref,        # (4, E)  f32     rows: b1, b2, b3, b4 (broadcast)
    out_ref,      # (1, TB) f32
):
    f32 = jnp.float32
    bf16 = jnp.bfloat16

    tb = feat_ref.shape[0]
    n_u = ufused_ref.shape[0]
    n_i = ifused_ref.shape[0]

    ids = ids_ref[...]                                   # (TB, 2) int32
    uid = ids[:, 0:1]
    iid = ids[:, 1:2]

    # --- content_transform: Linear -> ReLU -> (Dropout=id) -> Linear --------
    h = jnp.dot(feat_ref[...], w1_ref[...], preferred_element_type=f32) + b_ref[0:1, :]
    h = jnp.maximum(h, 0.0)
    content = jnp.dot(h.astype(bf16), wstk_ref[0], preferred_element_type=f32) + b_ref[1:2, :]

    # --- predictor.0 via fused tables: p = 1hot_u@Ufused + 1hot_i@Ifused + c@w3c
    u_onehot = (jax.lax.broadcasted_iota(jnp.int32, (tb, n_u), 1) == uid).astype(bf16)
    i_onehot = (jax.lax.broadcasted_iota(jnp.int32, (tb, n_i), 1) == iid).astype(bf16)
    p = jnp.dot(u_onehot, ufused_ref[...], preferred_element_type=f32)
    p = p + jnp.dot(i_onehot, ifused_ref[...], preferred_element_type=f32)
    p = p + jnp.dot(content.astype(bf16), wstk_ref[1], preferred_element_type=f32)
    p = jnp.maximum(p + b_ref[2:3, :], 0.0)              # (TB, E) f32

    # --- predictor.3 + Sigmoid, lane-dense (1, TB) output --------------------
    logit = jax.lax.dot_general(
        w4t_ref[...], p.astype(bf16),
        dimension_numbers=(((1,), (1,)), ((), ())),
        preferred_element_type=f32,
    )                                                     # (1, TB)
    out_ref[...] = jax.nn.sigmoid(logit + b_ref[3:4, 0:1])


def prepare_params(params):
    """One-time parameter preparation (casts, fusion, padding).  Call once."""
    E = params["user_embeddings"].shape[1]

    def _pad_rows(t, m=16):   # bf16 native sublane tile is 16 rows
        r = t.shape[0]
        return jnp.pad(t, ((0, _round_up(r, m) - r), (0, 0)))

    w3 = params["w3"].astype(jnp.float32)
    w3u, w3i, w3c = w3[:E], w3[E:2 * E], w3[2 * E:]

    ufused = _pad_rows(params["user_embeddings"].astype(jnp.float32) @ w3u).astype(jnp.bfloat16)
    ifused = _pad_rows(params["item_embeddings"].astype(jnp.float32) @ w3i).astype(jnp.bfloat16)

    wstk = jnp.stack(
        [params["w2"].astype(jnp.bfloat16), w3c.astype(jnp.bfloat16)], axis=0
    )                                                     # (2, E, E)
    biases = jnp.concatenate(
        [
            params["b1"].astype(jnp.float32).reshape(1, E),
            params["b2"].astype(jnp.float32).reshape(1, E),
            params["b3"].astype(jnp.float32).reshape(1, E),
            jnp.broadcast_to(params["b4"].astype(jnp.float32).reshape(1, 1), (1, E)),
        ],
        axis=0,
    )                                                     # (4, E)

    return {
        "ufused": ufused,
        "ifused": ifused,
        "w1": params["w1"].astype(jnp.bfloat16),          # (F, E)
        "wstk": wstk,                                      # (2, E, E)
        "w4t": params["w4"].T.astype(jnp.bfloat16),        # (1, E)
        "biases": biases,                                  # (4, E)
    }


def hybrid_recommender_forward(user_ids, item_ids, item_features, prepared, *, block_rows=512):
    """Fused HybridRecommender inference.  Returns (B, 1) float32 scores."""
    F, E = prepared["w1"].shape
    B = int(user_ids.shape[0])

    # Tile policy: tiny batches use one small tile; larger batches use tiles
    # up to block_rows but always >= 2 grid steps so v7x's 2 TensorCores both
    # get work (dimension_semantics=("parallel",) shards the grid across TCs).
    if B <= 128:
        tb = _round_up(max(B, 8), 16)
    else:
        tb = min(block_rows, _round_up(pl.cdiv(B, 2), 128))
    Bp = _round_up(B, tb)
    pad = Bp - B

    ids = jnp.stack([user_ids.astype(jnp.int32), item_ids.astype(jnp.int32)], axis=1)
    ids = jnp.pad(ids, ((0, pad), (0, 0)))                          # (Bp, 2)
    feats = jnp.pad(item_features.astype(jnp.bfloat16), ((0, pad), (0, 0)))  # (Bp, F)

    in_specs = [
        pl.BlockSpec((tb, 2), lambda i: (i, 0)),                    # ids (batch-tiled)
        pl.BlockSpec((tb, F), lambda i: (i, 0)),                    # features (batch-tiled)
        pl.BlockSpec(prepared["ufused"].shape, lambda i: (0, 0)),   # fused user table (resident)
        pl.BlockSpec(prepared["ifused"].shape, lambda i: (0, 0)),   # fused item table (resident)
        pl.BlockSpec((F, E), lambda i: (0, 0)),                     # w1
        pl.BlockSpec((2, E, E), lambda i: (0, 0, 0)),               # [w2, w3_content]
        pl.BlockSpec((1, E), lambda i: (0, 0)),                     # w4^T
        pl.BlockSpec((4, E), lambda i: (0, 0)),                     # [b1, b2, b3, b4]
    ]
    out_spec = pl.BlockSpec((1, tb), lambda i: (0, i))              # lane-dense output slab

    out = pl.pallas_call(
        _hybrid_kernel,
        out_shape=jax.ShapeDtypeStruct((1, Bp), jnp.float32),
        grid=(Bp // tb,),
        in_specs=in_specs,
        out_specs=out_spec,
        compiler_params=pltpu.CompilerParams(
            dimension_semantics=("parallel",),          # megacore batch split (v7x)
            vmem_limit_bytes=48 * 1024 * 1024,          # safe on v7x's 64 MiB VMEM
        ),
    )(ids, feats, prepared["ufused"], prepared["ifused"],
      prepared["w1"], prepared["wstk"], prepared["w4t"], prepared["biases"])

    return out[0, :B].reshape(B, 1)


def init_params(key, n_users, n_items, embedding_dim, n_factors):
    ks = jax.random.split(key, 6)
    E, F = embedding_dim, n_factors

    def lin(k, fan_in, fan_out):
        # PyTorch Linear default init: U(-1/sqrt(fan_in), 1/sqrt(fan_in))
        bound = 1.0 / jnp.sqrt(fan_in)
        kw, kb = jax.random.split(k)
        w = jax.random.uniform(kw, (fan_in, fan_out), jnp.float32, -bound, bound)
        b = jax.random.uniform(kb, (1, fan_out), jnp.float32, -bound, bound)
        return w, b

    w1, b1 = lin(ks[2], F, E)
    w2, b2 = lin(ks[3], E, E)
    w3, b3 = lin(ks[4], 3 * E, E)
    w4, b4 = lin(ks[5], E, 1)

    return {
        "user_embeddings": jax.random.normal(ks[0], (n_users, E), jnp.float32),
        "item_embeddings": jax.random.normal(ks[1], (n_items, E), jnp.float32),
        "w1": w1, "b1": b1,
        "w2": w2, "b2": b2,
        "w3": w3, "b3": b3,
        "w4": w4, "b4": b4,
    }


def _reference(user_ids, item_ids, item_features, params):
    """Plain-JAX f32 reference (eval-mode dropout == identity)."""
    ue = params["user_embeddings"][user_ids]
    ie = params["item_embeddings"][item_ids]
    h = jnp.maximum(item_features @ params["w1"] + params["b1"], 0.0)
    ce = h @ params["w2"] + params["b2"]
    comb = jnp.concatenate([ue, ie, ce], axis=1)
    p = jnp.maximum(comb @ params["w3"] + params["b3"], 0.0)
    return jax.nn.sigmoid(p @ params["w4"] + params["b4"])


if __name__ == "__main__":
    key = jax.random.PRNGKey(0)
    kp, ku, ki, kf, ku2, ki2, kf2 = jax.random.split(key, 7)

    n_users, n_items = 10, 20
    embedding_dim, n_factors = 32, 16

    params = init_params(kp, n_users, n_items, embedding_dim, n_factors)
    prepared = prepare_params(params)          # one-time param prep (fusion, casts, padding)

    # Small demo batch (single tile, grid=(1,)).
    B = 8
    user_ids = jax.random.randint(ku, (B,), 0, n_users)
    item_ids = jax.random.randint(ki, (B,), 0, n_items)
    item_features = jax.random.normal(kf, (B, n_factors), jnp.float32)

    out = hybrid_recommender_forward(user_ids, item_ids, item_features, prepared)
    jax.block_until_ready(out)
    ref = _reference(user_ids, item_ids, item_features, params)
    assert out.shape == (B, 1)
    assert jnp.allclose(out, ref, atol=2e-2, rtol=2e-2)

    # Larger batch exercising padding + multi-tile (grid >= 2, parallel path).
    B2 = 200
    user_ids2 = jax.random.randint(ku2, (B2,), 0, n_users)
    item_ids2 = jax.random.randint(ki2, (B2,), 0, n_items)
    item_features2 = jax.random.normal(kf2, (B2, n_factors), jnp.float32)

    out2 = hybrid_recommender_forward(user_ids2, item_ids2, item_features2, prepared)
    jax.block_until_ready(out2)
    ref2 = _reference(user_ids2, item_ids2, item_features2, params)
    assert out2.shape == (B2, 1)
    assert jnp.allclose(out2, ref2, atol=2e-2, rtol=2e-2)

    print("KERNEL_OK")
</pallas_src>

<mosaic_0001>
module attributes {stable_mosaic.version = 11 : i64} {
  func.func @_hybrid_kernel(%arg0: i32, %arg1: memref<16x2xi32, #tpu.memory_space<vmem>>, %arg2: memref<16x16xbf16, #tpu.memory_space<vmem>>, %arg3: memref<16x32xbf16, #tpu.memory_space<vmem>>, %arg4: memref<32x32xbf16, #tpu.memory_space<vmem>>, %arg5: memref<16x32xbf16, #tpu.memory_space<vmem>>, %arg6: memref<2x32x32xbf16, #tpu.memory_space<vmem>>, %arg7: memref<1x32xbf16, #tpu.memory_space<vmem>>, %arg8: memref<4x32xf32, #tpu.memory_space<vmem>>, %arg9: memref<1x16xf32, #tpu.memory_space<vmem>>) attributes {dimension_semantics = [#tpu.dimension_semantics<parallel>], iteration_bounds = array<i64: 1>, scalar_prefetch = 0 : i64, scratch_operands = 0 : i64, tpu.core_type = #tpu.core_type<tc>, window_params = [{transform_indices = @transform_0, window_bounds = array<i64: 16, 2>}, {transform_indices = @transform_1, window_bounds = array<i64: 16, 16>}, {pipeline_mode = #tpu.pipeline_mode<synchronous>, transform_indices = @transform_2, window_bounds = array<i64: 16, 32>}, {pipeline_mode = #tpu.pipeline_mode<synchronous>, transform_indices = @transform_3, window_bounds = array<i64: 32, 32>}, {pipeline_mode = #tpu.pipeline_mode<synchronous>, transform_indices = @transform_4, window_bounds = array<i64: 16, 32>}, {pipeline_mode = #tpu.pipeline_mode<synchronous>, transform_indices = @transform_5, window_bounds = array<i64: 2, 32, 32>}, {pipeline_mode = #tpu.pipeline_mode<synchronous>, transform_indices = @transform_6, window_bounds = array<i64: 1, 32>}, {pipeline_mode = #tpu.pipeline_mode<synchronous>, transform_indices = @transform_7, window_bounds = array<i64: 4, 32>}, {transform_indices = @transform_8, window_bounds = array<i64: 1, 16>}]} {
    %c0 = arith.constant 0 : index
    %c0_0 = arith.constant 0 : index
    %0 = vector.load %arg1[%c0, %c0_0] : memref<16x2xi32, #tpu.memory_space<vmem>>, vector<16x2xi32>
    %1 = vector.extract_strided_slice %0 {offsets = [0, 0], sizes = [16, 1], strides = [1, 1]} : vector<16x2xi32> to vector<16x1xi32>
    %2 = vector.extract_strided_slice %0 {offsets = [0, 1], sizes = [16, 1], strides = [1, 1]} : vector<16x2xi32> to vector<16x1xi32>
    %c0_1 = arith.constant 0 : index
    %c0_2 = arith.constant 0 : index
    %3 = vector.load %arg2[%c0_1, %c0_2] : memref<16x16xbf16, #tpu.memory_space<vmem>>, vector<16x16xbf16>
    %c0_3 = arith.constant 0 : index
    %c0_4 = arith.constant 0 : index
    %4 = vector.load %arg5[%c0_3, %c0_4] : memref<16x32xbf16, #tpu.memory_space<vmem>>, vector<16x32xbf16>
    %cst = arith.constant dense<0.000000e+00> : vector<16x32xf32>
    %5 = tpu.matmul %3, %4, %cst {dimension_numbers = #tpu.dot_dimension_numbers<[1], [0], [0], [1], [0, 0, 1, 1], [], []>} : vector<16x16xbf16>, vector<16x32xbf16>, vector<16x32xf32> -> vector<16x32xf32>
    %c0_5 = arith.constant 0 : index
    %c0_6 = arith.constant 0 : index
    %6 = vector.load %arg8[%c0_5, %c0_6] : memref<4x32xf32, #tpu.memory_space<vmem>>, vector<1x32xf32>
    %7 = vector.broadcast %6 : vector<1x32xf32> to vector<16x32xf32>
    %8 = arith.addf %5, %7 : vector<16x32xf32>
    %cst_7 = arith.constant 0.000000e+00 : f32
    %9 = vector.broadcast %cst_7 : f32 to vector<16x32xf32>
    %10 = arith.maximumf %8, %9 : vector<16x32xf32>
    %11 = arith.truncf %10 : vector<16x32xf32> to vector<16x32xbf16>
    %c0_8 = arith.constant 0 : index
    %c0_9 = arith.constant 0 : index
    %c0_10 = arith.constant 0 : index
    %12 = vector.load %arg6[%c0_8, %c0_9, %c0_10] : memref<2x32x32xbf16, #tpu.memory_space<vmem>>, vector<1x32x32xbf16>
    %13 = vector.shape_cast %12 : vector<1x32x32xbf16> to vector<32x32xbf16>
    %cst_11 = arith.constant dense<0.000000e+00> : vector<16x32xf32>
    %14 = tpu.matmul %11, %13, %cst_11 {dimension_numbers = #tpu.dot_dimension_numbers<[1], [0], [0], [1], [0, 0, 1, 1], [], []>} : vector<16x32xbf16>, vector<32x32xbf16>, vector<16x32xf32> -> vector<16x32xf32>
    %c1 = arith.constant 1 : index
    %c0_12 = arith.constant 0 : index
    %15 = vector.load %arg8[%c1, %c0_12] : memref<4x32xf32, #tpu.memory_space<vmem>>, vector<1x32xf32>
    %16 = vector.broadcast %15 : vector<1x32xf32> to vector<16x32xf32>
    %17 = arith.addf %14, %16 : vector<16x32xf32>
    %18 = tpu.iota {dimensions = array<i32: 1>} : vector<16x16xi32>
    %19 = vector.broadcast %1 : vector<16x1xi32> to vector<16x16xi32>
    %20 = arith.cmpi eq, %18, %19 : vector<16x16xi32>
    %21 = arith.extui %20 : vector<16x16xi1> to vector<16x16xi32>
    %22 = arith.sitofp %21 : vector<16x16xi32> to vector<16x16xf32>
    %23 = arith.truncf %22 : vector<16x16xf32> to vector<16x16xbf16>
    %24 = tpu.iota {dimensions = array<i32: 1>} : vector<16x32xi32>
    %25 = vector.broadcast %2 : vector<16x1xi32> to vector<16x32xi32>
    %26 = arith.cmpi eq, %24, %25 : vector<16x32xi32>
    %27 = arith.extui %26 : vector<16x32xi1> to vector<16x32xi32>
    %28 = arith.sitofp %27 : vector<16x32xi32> to vector<16x32xf32>
    %29 = arith.truncf %28 : vector<16x32xf32> to vector<16x32xbf16>
    %c0_13 = arith.constant 0 : index
    %c0_14 = arith.constant 0 : index
    %30 = vector.load %arg3[%c0_13, %c0_14] : memref<16x32xbf16, #tpu.memory_space<vmem>>, vector<16x32xbf16>
    %cst_15 = arith.constant dense<0.000000e+00> : vector<16x32xf32>
    %31 = tpu.matmul %23, %30, %cst_15 {dimension_numbers = #tpu.dot_dimension_numbers<[1], [0], [0], [1], [0, 0, 1, 1], [], []>} : vector<16x16xbf16>, vector<16x32xbf16>, vector<16x32xf32> -> vector<16x32xf32>
    %c0_16 = arith.constant 0 : index
    %c0_17 = arith.constant 0 : index
    %32 = vector.load %arg4[%c0_16, %c0_17] : memref<32x32xbf16, #tpu.memory_space<vmem>>, vector<32x32xbf16>
    %cst_18 = arith.constant dense<0.000000e+00> : vector<16x32xf32>
    %33 = tpu.matmul %29, %32, %cst_18 {dimension_numbers = #tpu.dot_dimension_numbers<[1], [0], [0], [1], [0, 0, 1, 1], [], []>} : vector<16x32xbf16>, vector<32x32xbf16>, vector<16x32xf32> -> vector<16x32xf32>
    %34 = arith.addf %31, %33 : vector<16x32xf32>
    %35 = arith.truncf %17 : vector<16x32xf32> to vector<16x32xbf16>
    %c1_19 = arith.constant 1 : index
    %c0_20 = arith.constant 0 : index
    %c0_21 = arith.constant 0 : index
    %36 = vector.load %arg6[%c1_19, %c0_20, %c0_21] : memref<2x32x32xbf16, #tpu.memory_space<vmem>>, vector<1x32x32xbf16>
    %37 = vector.shape_cast %36 : vector<1x32x32xbf16> to vector<32x32xbf16>
    %cst_22 = arith.constant dense<0.000000e+00> : vector<16x32xf32>
    %38 = tpu.matmul %35, %37, %cst_22 {dimension_numbers = #tpu.dot_dimension_numbers<[1], [0], [0], [1], [0, 0, 1, 1], [], []>} : vector<16x32xbf16>, vector<32x32xbf16>, vector<16x32xf32> -> vector<16x32xf32>
    %39 = arith.addf %34, %38 : vector<16x32xf32>
    %c2 = arith.constant 2 : index
    %c0_23 = arith.constant 0 : index
    %40 = vector.load %arg8[%c2, %c0_23] : memref<4x32xf32, #tpu.memory_space<vmem>>, vector<1x32xf32>
    %41 = vector.broadcast %40 : vector<1x32xf32> to vector<16x32xf32>
    %42 = arith.addf %39, %41 : vector<16x32xf32>
    %cst_24 = arith.constant 0.000000e+00 : f32
    %43 = vector.broadcast %cst_24 : f32 to vector<16x32xf32>
    %44 = arith.maximumf %42, %43 : vector<16x32xf32>
    %c0_25 = arith.constant 0 : index
    %c0_26 = arith.constant 0 : index
    %45 = vector.load %arg7[%c0_25, %c0_26] : memref<1x32xbf16, #tpu.memory_space<vmem>>, vector<1x32xbf16>
    %46 = arith.truncf %44 : vector<16x32xf32> to vector<16x32xbf16>
    %cst_27 = arith.constant dense<0.000000e+00> : vector<1x16xf32>
    %47 = tpu.matmul %45, %46, %cst_27 {dimension_numbers = #tpu.dot_dimension_numbers<[1], [1], [0], [0], [0, 0, 1, 0], [], []>} : vector<1x32xbf16>, vector<16x32xbf16>, vector<1x16xf32> -> vector<1x16xf32>
    %c3 = arith.constant 3 : index
    %c0_28 = arith.constant 0 : index
    %48 = vector.load %arg8[%c3, %c0_28] : memref<4x32xf32, #tpu.memory_space<vmem>>, vector<1x1xf32>
    %49 = vector.broadcast %48 : vector<1x1xf32> to vector<1x16xf32>
    %50 = arith.addf %47, %49 : vector<1x16xf32>
    %51 = arith.negf %50 : vector<1x16xf32>
    %52 = math.exp %51 : vector<1x16xf32>
    %cst_29 = arith.constant 1.000000e+00 : f32
    %53 = vector.broadcast %cst_29 : f32 to vector<1x16xf32>
    %54 = arith.addf %53, %52 : vector<1x16xf32>
    %55 = arith.divf %53, %54 : vector<1x16xf32>
    %c0_30 = arith.constant 0 : index
    %c0_31 = arith.constant 0 : index
    %56 = vector.load %arg9[%c0_30, %c0_31] : memref<1x16xf32, #tpu.memory_space<vmem>>, vector<1x16xf32>
    tpu.vector_store %arg9[%c0_30, %c0_31], %55 {strides = array<i32>} : memref<1x16xf32, #tpu.memory_space<vmem>>, vector<1x16xf32>,
    return
  }
  func.func @transform_0(%arg0: i32) -> (i32, i32) {
    %c0_i32 = arith.constant 0 : i32
    %c0_i32_0 = arith.constant 0 : i32
    return %arg0, %c0_i32 : i32, i32
  }
  func.func @transform_1(%arg0: i32) -> (i32, i32) {
    %c0_i32 = arith.constant 0 : i32
    %c0_i32_0 = arith.constant 0 : i32
    return %arg0, %c0_i32 : i32, i32
  }
  func.func @transform_2(%arg0: i32) -> (i32, i32) {
    %c0_i32 = arith.constant 0 : i32
    %c0_i32_0 = arith.constant 0 : i32
    %c0_i32_1 = arith.constant 0 : i32
    return %c0_i32, %c0_i32_0 : i32, i32
  }
  func.func @transform_3(%arg0: i32) -> (i32, i32) {
    %c0_i32 = arith.constant 0 : i32
    %c0_i32_0 = arith.constant 0 : i32
    %c0_i32_1 = arith.constant 0 : i32
    return %c0_i32, %c0_i32_0 : i32, i32
  }
  func.func @transform_4(%arg0: i32) -> (i32, i32) {
    %c0_i32 = arith.constant 0 : i32
    %c0_i32_0 = arith.constant 0 : i32
    %c0_i32_1 = arith.constant 0 : i32
    return %c0_i32, %c0_i32_0 : i32, i32
  }
  func.func @transform_5(%arg0: i32) -> (i32, i32, i32) {
    %c0_i32 = arith.constant 0 : i32
    %c0_i32_0 = arith.constant 0 : i32
    %c0_i32_1 = arith.constant 0 : i32
    %c0_i32_2 = arith.constant 0 : i32
    return %c0_i32, %c0_i32_0, %c0_i32_1 : i32, i32, i32
  }
  func.func @transform_6(%arg0: i32) -> (i32, i32) {
    %c0_i32 = arith.constant 0 : i32
    %c0_i32_0 = arith.constant 0 : i32
    %c0_i32_1 = arith.constant 0 : i32
    return %c0_i32, %c0_i32_0 : i32, i32
  }
  func.func @transform_7(%arg0: i32) -> (i32, i32) {
    %c0_i32 = arith.constant 0 : i32
    %c0_i32_0 = arith.constant 0 : i32
    %c0_i32_1 = arith.constant 0 : i32
    return %c0_i32, %c0_i32_0 : i32, i32
  }
  func.func @transform_8(%arg0: i32) -> (i32, i32) {
    %c0_i32 = arith.constant 0 : i32
    %c0_i32_0 = arith.constant 0 : i32
    return %c0_i32, %arg0 : i32, i32
  }
}

</mosaic_0001>

<bundles_post_ra>
// kernel: tpu_custom_call.1
= control target key start
LH: loop header
LB: loop body
LE: loop exit
PB: predicated region body
PF: predicated region fallthrough
CT: control target
= control target key end

     0   :  { %13 = vsyncpa [#allocation3], 0  ;;  %s857_s0 = inlined_call_operand.vmem [shape: s32[16,2], index: 0, kind: input, shape index: {}]   ;;  %s858_s1 = inlined_call_operand.hbm [shape: bf16[16,16], index: 1, kind: input, shape index: {}]   ;;  %s859_s2 = inlined_call_operand.hbm [shape: bf16[16,32], index: 2, kind: input, shape index: {}]   ;;  %s860_s3 = inlined_call_operand.vmem [shape: bf16[32,32], index: 3, kind: input, shape index: {}]   ;;  %s861_s4 = inlined_call_operand.vmem [shape: bf16[16,32], index: 4, kind: input, shape index: {}]   ;;  %s862_s5 = inlined_call_operand.hbm [shape: bf16[2,32,32], index: 5, kind: input, shape index: {}]   ;;  %s863_s6 = inlined_call_operand.hbm [shape: bf16[1,32], index: 6, kind: input, shape index: {}]   ;;  %s864_s7 = inlined_call_operand.vmem [shape: f32[4,32], index: 7, kind: input, shape index: {}]   ;;  %s865_s8 = inlined_call_operand.hbm [shape: f32[1,16], index: 8, kind: output, shape index: {}]  }
   0x1   :  { %14 = vsyncpa [#allocation6], 0 }
   0x2   :  { %15 = vsyncpa [#allocation9], 0 }
   0x3   :  { %16 = vsyncpa [#allocation4], 0  ;;  %s727_s27 = smov [#allocation5]   ;;  %s728_s29 = smov [#allocation2]  }
   0x4   :  { %s36_s28 = sshll.u32 %s727_s27, 4  ;;  %s24_s30 = sshll.u32 %s728_s29, 4  ;;  %s37_s28 = int_to_ptr.vmem [resolvable:$true] %s36_s28  ;;  %s25_s30 = int_to_ptr.vmem [resolvable:$true] %s24_s30 }
   0x5   :  { %s627_s9 = scalar_lea.vmem %s37_s28, 128  ;;  %p632_p1 = scmp.lt.s32.totalorder %s37_s28, %s37_s28 }
   0x6   :  { %p628_p0 = scmp.ne.s32.totalorder %s37_s28, %s627_s9  ;;  %p633_p2 = scmp.lt.s32.totalorder %s627_s9, %s627_s9 }
   0x8   :  { %p634_p3 = por %p633_p2, %p632_p1 }
   0xa   :  { %p635_p4 = pnand %p634_p3, %p628_p0 }
   0xc   :  { %638 = shalt.err (!%p635_p4)
}
   0xd   :  { %s729_s10 = smov 64   ;;  %s730_s11 = smov 4  }
   0xe   :  { %42 = dma.hbm_to_vmem [thread:$0]  %s859_s2, 128, %s37_s28, [#allocation6], %s729_s10, %s729_s10, %s730_s11  }
   0xf   :  { %s647_s14 = scalar_lea.vmem %s25_s30, 128  ;;  %p652_p6 = scmp.lt.s32.totalorder %s25_s30, %s25_s30 }
  0x10   :  { %p648_p5 = scmp.ne.s32.totalorder %s25_s30, %s647_s14  ;;  %p653_p7 = scmp.lt.s32.totalorder %s647_s14, %s647_s14 }
  0x12   :  { %p654_p8 = por %p653_p7, %p652_p6 }
  0x14   :  { %p655_p9 = pnand %p654_p8, %p648_p5 }
  0x16   :  { %658 = shalt.err (!%p655_p9)
}
  0x17   :  { %30 = dma.hbm_to_vmem [thread:$0]  %s858_s1, 128, %s25_s30, [#allocation3], %s729_s10, %s729_s10, %s730_s11  }
  0x18   :  { %s731_s17 = smov [#allocation7]   ;;  %s732_s19 = smov [#allocation8]  }
  0x19   :  { %s52_s18 = sshll.u32 %s731_s17, 4  ;;  %s65_s20 = sshll.u32 %s732_s19, 4  ;;  %s53_s18 = int_to_ptr.vmem [resolvable:$true] %s52_s18  ;;  %s66_s20 = int_to_ptr.vmem [resolvable:$true] %s65_s20 }
  0x1a   :  { %s667_s21 = scalar_lea.vmem %s53_s18, 512  ;;  %p672_p11 = scmp.lt.s32.totalorder %s53_s18, %s53_s18 }
  0x1b   :  { %p668_p10 = scmp.ne.s32.totalorder %s53_s18, %s667_s21  ;;  %p673_p12 = scmp.lt.s32.totalorder %s667_s21, %s667_s21 }
  0x1d   :  { %p674_p13 = por %p673_p12, %p672_p11 }
  0x1f   :  { %p675_p0 = pnand %p674_p13, %p668_p10 }
  0x21   :  { %678 = shalt.err (!%p675_p0)
}
  0x22   :  { %58 = dma.hbm_to_vmem [thread:$0]  %s862_s5, 512, %s53_s18, [#allocation6], %s729_s10, %s729_s10, %s730_s11  }
  0x23   :  { %s687_s23 = scalar_lea.vmem %s66_s20, 16  ;;  %s691_s1 = scalar_lea.vmem %s66_s20, 32 }
  0x24   :  { %p688_p1 = scmp.ne.s32.totalorder %s66_s20, %s687_s23  ;;  %p692_p2 = scmp.lt.s32.totalorder %s66_s20, %s66_s20 }
  0x25   :  { %p693_p3 = scmp.lt.s32.totalorder %s691_s1, %s687_s23 }
  0x27   :  { %p694_p4 = por %p693_p3, %p692_p2 }
  0x29   :  { %p695_p5 = pnand %p694_p4, %p688_p1 }
  0x2b   :  { %698 = shalt.err (!%p695_p5)
}
  0x2c   :  { %68 = dma.hbm_to_vmem [thread:$0]  %s863_s6, 16, %s66_s20, [#allocation9]  }
  0x2d   :  { %719 = dma.done.wait [#allocation3], 128  }
  0x2e   :  { %720 = vsyncadd [#allocation3], 4294967168 }
  0x2f   :  { %721 = dma.done.wait [#allocation6], 640  }
  0x30   :  { %722 = vsyncadd [#allocation6], 4294966656 }
  0x31   :  { %723 = dma.done.wait [#allocation9], 16  }
  0x32   :  { %724 = vsyncadd [#allocation9], 4294967280  ;;  %v733_v0 = vmov 0.0   ;;  %vm734_vm0 = vmmov 0   ;;  %v606_v1 = vld [vmem:[%s861_s4] sm:$0xff]   ;;  %v607_v2 = vld [vmem:[#allocation2] sm:$0xff]   ;;  %v220_v13 = vlaneseq }
  0x33   :  { %550 = vmatprep.subr.bf16.mxu0 %v733_v0  ;;  %552 = vmatprep.mubr.msk.bf16.mxu0 %vm734_vm0, %v733_v0  ;;  %vm106_vm1 = vcmask 130048   ;;  %v608_v3 = vld [vmem:[#allocation7 + $0x8] sm:$0xff]   ;;  %v609_v4 = vld [vmem:[#allocation7] sm:$0xff]   ;;  %v735_v7 = vmov 1   ;;  %v736_v8 = vmov 0   ;;  %vm175_vm2 = vcmask 261120  }
  0x34   :  { %556 = vmatprep.subr.bf16.mxu1 %v733_v0  ;;  %560 = vmatprep.mubr.msk.bf16.mxu1 %vm734_vm0, %v733_v0  ;;  %v84_v5 = vld [vmem:[%s857_s0] sm:$0xff]  ;;  %v610_v6 = vld [vmem:[%s860_s3 + $0x8] sm:$0xff]   ;;  %v221_v18 = vand.u32 127, %v220_v13  ;;  %v612_v24 = vld [vmem:[#allocation5] sm:$0xff]   ;;  %vm493_vm7 = vcmask 122880  }
  0x35   :  { %551 = vmatpush3.bf16.msra.mxu0 %v606_v1  ;;  %557 = vmatpush3.bf16.msra.mxu1 %v608_v3  ;;  %v85_v9 = vld [vmem:[%s857_s0 + $0x8] sm:$0xff]  ;;  %v611_v10 = vld [vmem:[%s860_s3] sm:$0xff]   ;;  %v613_v34 = vld [vmem:[#allocation7 + $0x18] sm:$0xff]  }
  0x36   :  { %564 = vmatprep.subr.bf16.mxu0 %v733_v0  ;;  %558 = vmatprep.subr.bf16.mxu1 %v733_v0  ;;  %v512_v11 = vld [vmem:[%s864_s7] ss:$0 sm:$0xff]  ;;  %v614_v35 = vld [vmem:[#allocation7 + $0x10] sm:$0xff]   ;;  %v516_v37 = vld [vmem:[%s864_s7 + $0x1] ss:$0 sm:$0xff] }
  0x37   :  { %603 = vset.pattern.permute.xlu0 %v735_v7  ;;  %604 = vset.pattern.permute.xlu1 %v736_v8  ;;  %v435_v54 = vld [vmem:[%s864_s7 + $0x3] sm:$0x1]  ;;  %v532_v57 = vld [vmem:[%s864_s7 + $0x2] ss:$0 sm:$0xff]  ;;  %s737_s7 = smov [#allocation10]  }
  0x38   :  { %553 = vmatmul.mubr.msk.bf16.vlgmr.msra.gmra.mxu0 %vm106_vm1, %v607_v2  ;;  %236 = vperm.xlu0 %603, %v84_v5   ;;  %s501_s17 = sshll.u32 %s737_s7, 4  ;;  %s502_s17 = int_to_ptr.vmem [resolvable:$true] %s501_s17 }
  0x39   :  { %568 = vmatprep.mubr.msk.bf16.mxu0 %vm734_vm0, %v733_v0  ;;  %559 = vmatpush3.bf16.msra.mxu1 %v609_v4  ;;  %v433_v4 = vld [vmem:[#allocation8] sm:$0x1]  ;;  %s699_s18 = scalar_lea.vmem %s502_s17, 16  ;;  %s703_s19 = scalar_lea.vmem %s502_s17, 32 }
  0x3a   :  { %572 = vmatprep.subr.bf16.mxu1 %v733_v0  ;;  %223 = vperm.xlu1 %604, %v84_v5   ;;  %p700_p6 = scmp.ne.s32.totalorder %s502_s17, %s699_s18  ;;  %p704_p7 = scmp.lt.s32.totalorder %s502_s17, %s502_s17 }
  0x3b   :  { %565 = vmatpush3.bf16.msra.mxu0 %v610_v6  ;;  %p705_p8 = scmp.lt.s32.totalorder %s703_s19, %s699_s18 }
  0x3c   :  { %566 = vmatprep.subr.bf16.mxu0 %v733_v0  ;;  %239 = vperm.xlu0 %603, %v85_v9  }
  0x3d   :  { %p706_p9 = por %p705_p8, %p704_p7 }
  0x3e   :  { %226 = vperm.xlu1 %604, %v85_v9  }
  0x3f   :  { %567 = vmatpush3.bf16.msra.mxu0 %v611_v10  ;;  %p707_p10 = pnand %p706_p9, %p700_p6 }
  0x40   :  { %578 = vmatprep.subr.bf16.mxu0 %v733_v0  ;;  %605 = vset.pattern.permute.xlu0 %v736_v8 }
  0x41   :  { %438 = vperm.xlu0 %605, %v435_v54  }
  0xb3   :  { %v237_v22 = vpop.permute.xlu0 %236 }
  0xb4   :  { %vm241_vm3 = vcmp.eq.s32.totalorder %v221_v18, %v237_v22 }
  0xb5   :  { %v224_v23 = vpop.permute.xlu1 %223  ;;  %v522_v26 = vsel %vm241_vm3, 1.0, %v733_v0 }
  0xb6   :  { %vm228_vm4 = vcmp.eq.s32.totalorder %v221_v18, %v224_v23 }
  0xb7   :  { %v520_v27 = vsel %vm228_vm4, 1.0, %v733_v0  ;;  %v240_v28 = vpop.permute.xlu0 %239 }
  0xb8   :  { %vm242_vm5 = vcmp.eq.s32.totalorder %v221_v18, %v240_v28 }
  0xb9   :  { %v227_v29 = vpop.permute.xlu1 %226  ;;  %v523_v30 = vsel %vm242_vm5, 1.0, %v733_v0 }
  0xba   :  { %vm229_vm6 = vcmp.eq.s32.totalorder %v221_v18, %v227_v29  ;;  %v247_v32 = vpack.c.bf16 %v523_v30, %v522_v26 }
  0xbb   :  { %v521_v31 = vsel %vm229_vm6, 1.0, %v733_v0 }
  0xbc   :  { %v234_v33 = vpack.c.bf16 %v521_v31, %v520_v27  ;;  %569 = vmatmul.mubr.msk.bf16.vlgmr.msra.gmra.mxu0 %vm175_vm2, %v247_v32  ;;  %v439_v5 = vpop.permute.xlu0 %438 }
  0xbd   :  { %582 = vmatprep.mubr.msk.bf16.mxu0 %vm734_vm0, %v733_v0  ;;  %579 = vmatpush3.bf16.msra.mxu0 %v613_v34 }
  0xbe   :  { %580 = vmatprep.subr.bf16.mxu0 %v733_v0 }
  0xc1   :  { %581 = vmatpush3.bf16.msra.mxu0 %v614_v35 }
  0xf8   :  { %v144_v12 = vpop.f32.mrf.mxu0 }
  0xf9   :  { %v145_v15 = vadd.f32 %v512_v11, %v144_v12 }
  0xfa   :  { %v554_v14 = vpop.f32.mrf.mxu0 }
  0xfb   :  { %v151_v20 = vmax.f32 %v145_v15, 0.0 }
  0xfc   :  { %v147_v16 = vpop.f32.mrf.mxu0 }
  0xfd   :  { %v148_v17 = vadd.f32 %v512_v11, %v147_v16 }
  0xfe   :  { %v555_v19 = vpop.f32.mrf.mxu0 }
  0xff   :  { %v152_v21 = vmax.f32 %v148_v17, 0.0 }
 0x101   :  { %v153_v25 = vpack.c.bf16 %v152_v21, %v151_v20 }
 0x103   :  { %561 = vmatmul.mubr.msk.bf16.vlgmr.msra.gmra.mxu1 %vm175_vm2, %v153_v25 }
 0x104   :  { %573 = vmatpush3.bf16.msra.mxu1 %v612_v24  ;;  %574 = vmatprep.mubr.msk.bf16.mxu1 %vm734_vm0, %v733_v0 }
 0x105   :  { %586 = vmatprep.subr.bf16.mxu1 %v733_v0 }
 0x10b   :  { %575 = vmatmul.mubr.msk.bf16.vlgmr.msra.gmra.mxu1 %vm106_vm1, %v234_v33 }
 0x10c   :  { %588 = vmatprep.mubr.msk.bf16.mxu1 %vm734_vm0, %v733_v0 }
 0x17c   :  { %v303_v43 = vpop.f32.mrf.mxu0 }
 0x17e   :  { %v570_v45 = vpop.f32.mrf.mxu0 }
 0x180   :  { %v306_v48 = vpop.f32.mrf.mxu0 }
 0x182   :  { %v571_v50 = vpop.f32.mrf.mxu0 }
 0x1c3   :  { %v213_v36 = vpop.f32.mrf.mxu1 }
 0x1c4   :  { %v214_v40 = vadd.f32 %v516_v37, %v213_v36 }
 0x1c5   :  { %v562_v38 = vpop.f32.mrf.mxu1 }
 0x1c7   :  { %v216_v39 = vpop.f32.mrf.mxu1 }
 0x1c8   :  { %v217_v41 = vadd.f32 %v516_v37, %v216_v39 }
 0x1c9   :  { %v563_v42 = vpop.f32.mrf.mxu1 }
 0x1ca   :  { %v360_v44 = vpack.c.bf16 %v217_v41, %v214_v40 }
 0x1cb   :  { %v353_v46 = vpop.f32.mrf.mxu1 }
 0x1cc   :  { %583 = vmatmul.mubr.msk.bf16.vlgmr.msra.gmra.mxu0 %vm175_vm2, %v360_v44  ;;  %v354_v47 = vadd.f32 %v353_v46, %v303_v43 }
 0x1cd   :  { %v576_v49 = vpop.f32.mrf.mxu1 }
 0x1cf   :  { %v356_v51 = vpop.f32.mrf.mxu1 }
 0x1d0   :  { %v357_v52 = vadd.f32 %v356_v51, %v306_v48 }
 0x1d1   :  { %v577_v53 = vpop.f32.mrf.mxu1 }
 0x28c   :  { %v415_v55 = vpop.f32.mrf.mxu0 }
 0x28d   :  { %v422_v56 = vadd.f32 %v415_v55, %v354_v47 }
 0x28e   :  { %v584_v58 = vpop.f32.mrf.mxu0 }
 0x28f   :  { %v429_v60 = vadd.f32 %v532_v57, %v422_v56 }
 0x290   :  { %v418_v59 = vpop.f32.mrf.mxu0 }
 0x291   :  { %v423_v61 = vadd.f32 %v418_v59, %v357_v52  ;;  %v431_v0 = vmax.f32 %v429_v60, 0.0 }
 0x292   :  { %v585_v62 = vpop.f32.mrf.mxu0 }
 0x293   :  { %v430_v63 = vadd.f32 %v532_v57, %v423_v61 }
 0x295   :  { %v432_v1 = vmax.f32 %v430_v63, 0.0 }
 0x297   :  { %v434_v2 = vpack.c.bf16 %v432_v1, %v431_v0 }
 0x299   :  { %v445_v3 = vsel %vm175_vm2, %v434_v2, 0 }
 0x29a   :  { %587 = vmatpush3.bf16.xpose.msra.mxu1 %v445_v3 }
 0x2a1   :  { %589 = vmatmul.mubr.msk.bf16.vlgmr.msra.gmra.mxu1 %vm175_vm2, %v433_v4 }
 0x361   :  { %v481_v6 = vpop.f32.mrf.mxu1 }
 0x362   :  { %v482_v7 = vadd.f32 %v481_v6, %v439_v5 }
 0x363   :  { %v590_v8 = vpop.f32.mrf.mxu1 }
 0x364   :  { %v534_v9 = vmul.f32 -1.442695, %v482_v7 }
 0x365   :  { %v484_v10 = vpop.f32.mrf.mxu1 }
 0x366   :  { %615 = vpow2.f32 %v534_v9 }
 0x367   :  { %v591_v11 = vpop.f32.mrf.mxu1 }
 0x373   :  { %v616_v12 = vpop.eup %615 }
 0x374   :  { %v490_v13 = vadd.f32 1.0, %v616_v12 }
 0x376   :  { %617 = vrcp.f32 %v490_v13 }
 0x383   :  { %v618_v14 = vpop.eup %617 }
 0x384   :  { %494 = vst.msk [vmem:[#allocation10] sm:$0x1] %vm493_vm7, %v618_v14 }
 0x385   :  { %710 = shalt.err (!%p707_p10)
}
 0x386   :  { %504 = dma.vmem_to_hbm [thread:$0]  %s502_s17, 16, %s865_s8, [#allocation4]  }
 0x387   :  { %725 = dma.done.wait [#allocation4], 16  }
 0x388   :  { %726 = vsyncadd [#allocation4], 4294967280 }
 0x389   :  { %508 = vsyncpa [#allocation3], 1 }
 0x38a   :  { %509 = vsyncpa [#allocation6], 1 }
 0x38b   :  { %510 = vsyncpa [#allocation9], 1 }
 0x38c   :  { %511 = vsyncpa [#allocation4], 1 }

</bundles_post_ra>
